<compile_context>
chip_gen: v7x
topology: tpu7x:2x2x1
jax: 0.10.0
libtpu: 0.0.40
codegen_flags: <defaults>
</compile_context>

<pallas_src>
import jax
import jax.numpy as jnp
from jax.experimental import pallas as pl
from jax.experimental.pallas import tpu as pltpu


def _round_up(x, m):
    return ((x + m - 1) // m) * m


# -----------------------------------------------------------------------------
# Pallas kernel: entire T-step TGCN recurrence in a single (grid-less) launch.
# -----------------------------------------------------------------------------
def _tgcn_seq_kernel(a_ref, xp_ref, b_ref, h0_ref,
                     whzr_ref, whh_ref, hw_ref, hb_ref,
                     y_ref, h_out_ref,
                     conv_sc):
    n, op = h0_ref.shape          # op = lane-padded hidden width (multiple of 128)
    t = y_ref.shape[1]
    g3 = 3 * op

    # ---- Prologue: H-independent GCN aggregation for ALL T steps at once.
    #      conv[:, i*3*OP : (i+1)*3*OP] = A_hat @ (X_i @ [W'z|W'r|W'h]) + b'
    conv_sc[...] = (
        jnp.dot(a_ref[...], xp_ref[...], preferred_element_type=jnp.float32)
        + b_ref[...])

    hb = hb_ref[0, 0]             # head bias, scalar read from SMEM

    # ---- Serial GRU recurrence.  T is static and small, so this loop is
    #      unrolled at trace time; every slice is a static whole-lane-tile slice.
    h = h0_ref[...]
    for i in range(t):
        base = i * g3
        cz = conv_sc[:, base:base + op]
        cr = conv_sc[:, base + op:base + 2 * op]
        ch = conv_sc[:, base + 2 * op:base + g3]

        hzr = jnp.dot(h, whzr_ref[...], preferred_element_type=jnp.float32)
        z = jax.nn.sigmoid(cz + hzr[:, :op])
        r = jax.nn.sigmoid(cr + hzr[:, op:])
        h_tilde = jnp.tanh(
            ch + jnp.dot(h * r, whh_ref[...], preferred_element_type=jnp.float32))
        h = z * h + (1.0 - z) * h_tilde

        # Head: y_t = relu(h_t) . head_w + head_b (VPU multiply + lane reduce).
        # The column write targets the VMEM-resident output block; its HBM
        # writeback happens once when the kernel finishes (no per-step DMA).
        y_col = jnp.sum(jnp.maximum(h, 0.0) * hw_ref[...],
                        axis=-1, keepdims=True) + hb
        y_ref[:, i:i + 1] = y_col

    h_out_ref[...] = h            # final hidden state, stored once


# -----------------------------------------------------------------------------
# Glue: dense GCN normalization (PyG GCNConv semantics, add_self_loops=True).
# TODO(synk): the sparse edge_index scatter-add has no clean Pallas TPU
# equivalent at this size; it stays in plain JAX.
# -----------------------------------------------------------------------------
def gcn_norm_dense(edge_index, edge_weight, num_nodes):
    row = edge_index[0]   # source
    col = edge_index[1]   # target
    loop = jnp.arange(num_nodes, dtype=edge_index.dtype)
    row = jnp.concatenate([row, loop])
    col = jnp.concatenate([col, loop])
    w = jnp.concatenate(
        [edge_weight, jnp.ones((num_nodes,), dtype=edge_weight.dtype)])
    deg = jnp.zeros((num_nodes,), dtype=edge_weight.dtype).at[col].add(w)
    dinv = jnp.where(deg > 0, jax.lax.rsqrt(deg), 0.0)
    norm = dinv[row] * w * dinv[col]
    # A_hat[target, source] so that out = A_hat @ x aggregates at the target.
    a_hat = jnp.zeros((num_nodes, num_nodes), dtype=edge_weight.dtype)
    a_hat = a_hat.at[col, row].add(norm)
    return a_hat


# -----------------------------------------------------------------------------
# Shared wrapper: hoisted X-projection (XLA glue) + one pallas_call for the
# whole recurrence.
# -----------------------------------------------------------------------------
def _tgcn_pallas_seq(a_hat, x_seq, h0, packed):
    t, n, f = x_seq.shape
    o = h0.shape[1]                      # true hidden size
    op = packed["whh"].shape[0]          # lane-padded hidden size (mult. of 128)

    # H-independent projection for all steps (hoisted out of the recurrence),
    # laid out lane-contiguous per step:
    #   xp[n, i*3*OP + k] = sum_f x_seq[i, n, f] * wx[f, k]
    xp = jnp.einsum("tnf,fk->ntk", x_seq, packed["wx"]).reshape(n, t * 3 * op)
    b_all = jnp.tile(packed["b"], (1, t))                       # (1, T*3*OP)

    h0p = jnp.zeros((n, op), jnp.float32).at[:, :o].set(h0)     # lane-pad hidden

    vmem = pltpu.MemorySpace.VMEM
    smem = pltpu.MemorySpace.SMEM
    y_nt, h_pad = pl.pallas_call(
        _tgcn_seq_kernel,
        out_shape=(jax.ShapeDtypeStruct((n, t), jnp.float32),    # y, one writeback
                   jax.ShapeDtypeStruct((n, op), jnp.float32)),  # final hidden
        in_specs=[
            pl.BlockSpec(memory_space=vmem),   # A_hat        (N, N)       resident
            pl.BlockSpec(memory_space=vmem),   # XP           (N, T*3*OP)  resident
            pl.BlockSpec(memory_space=vmem),   # gate biases  (1, T*3*OP)
            pl.BlockSpec(memory_space=vmem),   # H0 padded    (N, OP)
            pl.BlockSpec(memory_space=vmem),   # [L_zh|L_rh]  (OP, 2*OP)
            pl.BlockSpec(memory_space=vmem),   # L_hh         (OP, OP)
            pl.BlockSpec(memory_space=vmem),   # head weight  (1, OP)
            pl.BlockSpec(memory_space=smem),   # head bias    (1, 1) -> scalar path
        ],
        out_specs=(pl.BlockSpec(memory_space=vmem),
                   pl.BlockSpec(memory_space=vmem)),
        scratch_shapes=[pltpu.VMEM((n, t * 3 * op), jnp.float32)],  # conv_all
        compiler_params=pltpu.CompilerParams(
            # Everything resident here is <1 MiB; for large N (A_hat grows as
            # N^2) this budget must be re-derived against v7x's 64 MiB VMEM.
            vmem_limit_bytes=32 * 1024 * 1024),
    )(a_hat, xp, b_all, h0p,
      packed["whzr"], packed["whh"], packed["head_w"], packed["head_b"])

    y_seq = jnp.transpose(y_nt, (1, 0))[:, :, None]             # (T, N, 1)
    return y_seq, h_pad[:, :o]


@jax.jit
def my_tgcn_forward(x, edge_index, edge_weight, prev_hidden_state, packed):
    """Module-compatible single-step forward: (y, h, None)."""
    n = x.shape[0]
    a_hat = gcn_norm_dense(edge_index, edge_weight, n)
    y_seq, h_new = _tgcn_pallas_seq(a_hat, x[None], prev_hidden_state, packed)
    return y_seq[0], h_new, None


@jax.jit
def my_tgcn_run_sequence(a_hat, x_seq, h0, packed):
    """Run T recurrent steps in one pallas_call (A_hat precomputed/hoisted)."""
    return _tgcn_pallas_seq(a_hat, x_seq, h0, packed)


# -----------------------------------------------------------------------------
# Parameters: raw (TGCN-shaped) init + one-time folding / lane-tile packing.
# -----------------------------------------------------------------------------
def init_params(key, node_features, output_size):
    ks = jax.random.split(key, 16)
    s = 0.1
    f, o = node_features, output_size

    def w(k, shape):
        return (s * jax.random.normal(k, shape)).astype(jnp.float32)

    return {
        # GCNConv weights (stored transposed: (in, out)) + biases (1, out)
        "wz": w(ks[0], (f, o)), "bz": w(ks[1], (1, o)),
        "wr": w(ks[2], (f, o)), "br": w(ks[3], (1, o)),
        "wh": w(ks[4], (f, o)), "bh": w(ks[5], (1, o)),
        # Linear(2*o, o) split into conv part / hidden part (each (o, o))
        "lz_wc": w(ks[6], (o, o)), "lz_wh": w(ks[7], (o, o)), "lz_b": w(ks[8], (1, o)),
        "lr_wc": w(ks[9], (o, o)), "lr_wh": w(ks[10], (o, o)), "lr_b": w(ks[11], (1, o)),
        "lh_wc": w(ks[12], (o, o)), "lh_wh": w(ks[13], (o, o)), "lh_b": w(ks[14], (1, o)),
        # Head Linear(o, 1), stored transposed (o, 1)
        "lin_w": w(ks[15], (o, 1)),
        "lin_b": jnp.zeros((1, 1), dtype=jnp.float32),
    }


def pack_params(p, lane_tile=128):
    """One-time algebraic folding + lane-tile-padded slab packing (cold path)."""
    f, o = p["wz"].shape
    op = _round_up(o, lane_tile)

    def pad_cols(m, width):
        return jnp.zeros((m.shape[0], width), m.dtype).at[:, :m.shape[1]].set(m)

    def pad_both(m, rows, cols):
        return jnp.zeros((rows, cols), m.dtype).at[:m.shape[0], :m.shape[1]].set(m)

    # Fold each gate's post-conv Linear into the GCN weight:
    #   (A @ (X @ Wg) + bg) @ L_gc + l_gb == A @ (X @ (Wg @ L_gc)) + (bg @ L_gc + l_gb)
    wpz = p["wz"] @ p["lz_wc"]; bpz = p["bz"] @ p["lz_wc"] + p["lz_b"]
    wpr = p["wr"] @ p["lr_wc"]; bpr = p["br"] @ p["lr_wc"] + p["lr_b"]
    wph = p["wh"] @ p["lh_wc"]; bph = p["bh"] @ p["lh_wc"] + p["lh_b"]

    return {
        # Each gate occupies its own full 128-lane tile (zero-padded) so every
        # in-kernel gate slice is a whole-lane-tile slice (no lane rotations).
        "wx": jnp.concatenate([pad_cols(wpz, op), pad_cols(wpr, op),
                               pad_cols(wph, op)], axis=1),               # (F, 3*OP)
        "b": jnp.concatenate([pad_cols(bpz, op), pad_cols(bpr, op),
                              pad_cols(bph, op)], axis=1),                # (1, 3*OP)
        "whzr": jnp.concatenate([pad_both(p["lz_wh"], op, op),
                                 pad_both(p["lr_wh"], op, op)], axis=1),  # (OP, 2*OP)
        "whh": pad_both(p["lh_wh"], op, op),                              # (OP, OP)
        "head_w": pad_cols(p["lin_w"].T, op),                             # (1, OP)
        "head_b": p["lin_b"],                                             # (1, 1)
    }


# -----------------------------------------------------------------------------
# Pure-JAX reference (unfolded params) for correctness checking.
# -----------------------------------------------------------------------------
def _reference_step(a_hat, x, h, p):
    def gcn(w, b):
        return a_hat @ (x @ w) + b
    cz = gcn(p["wz"], p["bz"])
    cr = gcn(p["wr"], p["br"])
    ch = gcn(p["wh"], p["bh"])
    z = jax.nn.sigmoid(cz @ p["lz_wc"] + h @ p["lz_wh"] + p["lz_b"])
    r = jax.nn.sigmoid(cr @ p["lr_wc"] + h @ p["lr_wh"] + p["lr_b"])
    ht = jnp.tanh(ch @ p["lh_wc"] + (h * r) @ p["lh_wh"] + p["lh_b"])
    h_new = z * h + (1.0 - z) * ht
    y = jnp.maximum(h_new, 0.0) @ p["lin_w"] + p["lin_b"]
    return y, h_new


if __name__ == "__main__":
    key = jax.random.PRNGKey(0)
    k_x, k_w, k_h, k_p, k_seq = jax.random.split(key, 5)

    num_nodes = 16
    node_features = 4
    output_size = 32
    seq_len = 8

    # node features (one step)
    x = jax.random.normal(k_x, (num_nodes, node_features), dtype=jnp.float32)

    # a small deterministic graph: ring + skip-2 edges (directed both ways)
    src = jnp.arange(num_nodes, dtype=jnp.int32)
    dst1 = (src + 1) % num_nodes
    dst2 = (src + 2) % num_nodes
    edge_src = jnp.concatenate([src, dst1, src, dst2])
    edge_dst = jnp.concatenate([dst1, src, dst2, src])
    edge_index = jnp.stack([edge_src, edge_dst], axis=0)
    edge_weight = jax.random.uniform(
        k_w, (edge_index.shape[1],), minval=0.5, maxval=1.5, dtype=jnp.float32)

    prev_hidden_state = jax.random.normal(
        k_h, (num_nodes, output_size), dtype=jnp.float32)

    raw_params = init_params(k_p, node_features, output_size)
    packed = pack_params(raw_params)          # one-time folding, outside hot path

    # ---- single-step forward (module-compatible signature) -------------------
    y, h, none_out = my_tgcn_forward(
        x, edge_index, edge_weight, prev_hidden_state, packed)
    jax.block_until_ready((y, h))
    assert y.shape == (num_nodes, 1)
    assert h.shape == (num_nodes, output_size)
    assert none_out is None

    a_hat = gcn_norm_dense(edge_index, edge_weight, num_nodes)
    y_ref, h_ref = _reference_step(a_hat, x, prev_hidden_state, raw_params)
    assert jnp.allclose(y, y_ref, atol=1e-3, rtol=1e-3)
    assert jnp.allclose(h, h_ref, atol=1e-3, rtol=1e-3)

    # ---- T-step recurrence inside one pallas_call (A_hat hoisted) ------------
    x_seq = jax.random.normal(
        k_seq, (seq_len, num_nodes, node_features), dtype=jnp.float32)
    y_seq, h_final = my_tgcn_run_sequence(a_hat, x_seq, prev_hidden_state, packed)
    jax.block_until_ready((y_seq, h_final))
    assert y_seq.shape == (seq_len, num_nodes, 1)
    assert h_final.shape == (num_nodes, output_size)

    hh = prev_hidden_state
    ys = []
    for step in range(seq_len):
        yt, hh = _reference_step(a_hat, x_seq[step], hh, raw_params)
        ys.append(yt)
    y_seq_ref = jnp.stack(ys, axis=0)
    assert jnp.allclose(y_seq, y_seq_ref, atol=1e-3, rtol=1e-3)
    assert jnp.allclose(h_final, hh, atol=1e-3, rtol=1e-3)

    print("KERNEL_OK")
</pallas_src>

<mosaic_0001>
module attributes {stable_mosaic.version = 11 : i64} {
  func.func private @main(%arg0: i32) attributes {dimension_semantics = [#tpu.dimension_semantics<core_parallel>], iteration_bounds = array<i64: 2>, tpu.core_type = #tpu.core_type<sc_scalar_subcore>, window_params = []} {
    return
  }
}

module attributes {stable_mosaic.version = 11 : i64} {
  func.func private @main(%arg0: i32) attributes {dimension_semantics = [#tpu.dimension_semantics<core_parallel>], iteration_bounds = array<i64: 2>, tpu.core_type = #tpu.core_type<sc_scalar_subcore>, window_params = []} {
    return
  }
}

module attributes {stable_mosaic.version = 11 : i64} {
  func.func @_tgcn_seq_kernel(%arg0: memref<16x16xf32, #tpu.memory_space<vmem>>, %arg1: memref<16x384xf32, #tpu.memory_space<vmem>>, %arg2: memref<1x384xf32, #tpu.memory_space<vmem>>, %arg3: memref<16x128xf32, #tpu.memory_space<vmem>>, %arg4: memref<128x256xf32, #tpu.memory_space<vmem>>, %arg5: memref<128x128xf32, #tpu.memory_space<vmem>>, %arg6: memref<1x128xf32, #tpu.memory_space<vmem>>, %arg7: memref<1x1xf32, #tpu.memory_space<smem>>, %arg8: memref<16x1xf32, #tpu.memory_space<vmem>>, %arg9: memref<16x128xf32, #tpu.memory_space<vmem>>, %arg10: memref<16x384xf32, #tpu.memory_space<vmem>>) attributes {dimension_semantics = [], scalar_prefetch = 0 : i64, scratch_operands = 1 : i64, tpu.core_type = #tpu.core_type<tc>} {
    %c0 = arith.constant 0 : index
    %c0_0 = arith.constant 0 : index
    %0 = vector.load %arg0[%c0, %c0_0] : memref<16x16xf32, #tpu.memory_space<vmem>>, vector<16x16xf32>
    %c0_1 = arith.constant 0 : index
    %c0_2 = arith.constant 0 : index
    %1 = vector.load %arg1[%c0_1, %c0_2] : memref<16x384xf32, #tpu.memory_space<vmem>>, vector<16x384xf32>
    %cst = arith.constant dense<0.000000e+00> : vector<16x384xf32>
    %2 = tpu.matmul %0, %1, %cst {dimension_numbers = #tpu.dot_dimension_numbers<[1], [0], [0], [1], [0, 0, 1, 1], [], []>} : vector<16x16xf32>, vector<16x384xf32>, vector<16x384xf32> -> vector<16x384xf32>
    %c0_3 = arith.constant 0 : index
    %c0_4 = arith.constant 0 : index
    %3 = vector.load %arg2[%c0_3, %c0_4] : memref<1x384xf32, #tpu.memory_space<vmem>>, vector<1x384xf32>
    %4 = vector.broadcast %3 : vector<1x384xf32> to vector<16x384xf32>
    %5 = arith.addf %2, %4 : vector<16x384xf32>
    %c0_5 = arith.constant 0 : index
    %c0_6 = arith.constant 0 : index
    %6 = vector.load %arg10[%c0_5, %c0_6] : memref<16x384xf32, #tpu.memory_space<vmem>>, vector<16x384xf32>
    tpu.vector_store %arg10[%c0_5, %c0_6], %5 {strides = array<i32>} : memref<16x384xf32, #tpu.memory_space<vmem>>, vector<16x384xf32>,
    %c0_7 = arith.constant 0 : index
    %c0_8 = arith.constant 0 : index
    %7 = memref.load %arg7[%c0_7, %c0_8] : memref<1x1xf32, #tpu.memory_space<smem>>
    %c0_9 = arith.constant 0 : index
    %c0_10 = arith.constant 0 : index
    %8 = vector.load %arg3[%c0_9, %c0_10] : memref<16x128xf32, #tpu.memory_space<vmem>>, vector<16x128xf32>
    %c0_11 = arith.constant 0 : index
    %c0_12 = arith.constant 0 : index
    %9 = vector.load %arg10[%c0_11, %c0_12] : memref<16x384xf32, #tpu.memory_space<vmem>>, vector<16x128xf32>
    %c0_13 = arith.constant 0 : index
    %c128 = arith.constant 128 : index
    %10 = vector.load %arg10[%c0_13, %c128] : memref<16x384xf32, #tpu.memory_space<vmem>>, vector<16x128xf32>
    %c0_14 = arith.constant 0 : index
    %c256 = arith.constant 256 : index
    %11 = vector.load %arg10[%c0_14, %c256] : memref<16x384xf32, #tpu.memory_space<vmem>>, vector<16x128xf32>
    %c0_15 = arith.constant 0 : index
    %c0_16 = arith.constant 0 : index
    %12 = vector.load %arg4[%c0_15, %c0_16] : memref<128x256xf32, #tpu.memory_space<vmem>>, vector<128x256xf32>
    %cst_17 = arith.constant dense<0.000000e+00> : vector<16x256xf32>
    %13 = tpu.matmul %8, %12, %cst_17 {dimension_numbers = #tpu.dot_dimension_numbers<[1], [0], [0], [1], [0, 0, 1, 1], [], []>} : vector<16x128xf32>, vector<128x256xf32>, vector<16x256xf32> -> vector<16x256xf32>
    %14 = vector.extract_strided_slice %13 {offsets = [0, 0], sizes = [16, 128], strides = [1, 1]} : vector<16x256xf32> to vector<16x128xf32>
    %15 = arith.addf %9, %14 : vector<16x128xf32>
    %16 = arith.negf %15 : vector<16x128xf32>
    %17 = math.exp %16 : vector<16x128xf32>
    %cst_18 = arith.constant 1.000000e+00 : f32
    %18 = vector.broadcast %cst_18 : f32 to vector<16x128xf32>
    %19 = arith.addf %18, %17 : vector<16x128xf32>
    %20 = arith.divf %18, %19 : vector<16x128xf32>
    %21 = vector.extract_strided_slice %13 {offsets = [0, 128], sizes = [16, 128], strides = [1, 1]} : vector<16x256xf32> to vector<16x128xf32>
    %22 = arith.addf %10, %21 : vector<16x128xf32>
    %23 = arith.negf %22 : vector<16x128xf32>
    %24 = math.exp %23 : vector<16x128xf32>
    %cst_19 = arith.constant 1.000000e+00 : f32
    %25 = vector.broadcast %cst_19 : f32 to vector<16x128xf32>
    %26 = arith.addf %25, %24 : vector<16x128xf32>
    %27 = arith.divf %25, %26 : vector<16x128xf32>
    %28 = arith.mulf %8, %27 : vector<16x128xf32>
    %c0_20 = arith.constant 0 : index
    %c0_21 = arith.constant 0 : index
    %29 = vector.load %arg5[%c0_20, %c0_21] : memref<128x128xf32, #tpu.memory_space<vmem>>, vector<128x128xf32>
    %cst_22 = arith.constant dense<0.000000e+00> : vector<16x128xf32>
    %30 = tpu.matmul %28, %29, %cst_22 {dimension_numbers = #tpu.dot_dimension_numbers<[1], [0], [0], [1], [0, 0, 1, 1], [], []>} : vector<16x128xf32>, vector<128x128xf32>, vector<16x128xf32> -> vector<16x128xf32>
    %31 = arith.addf %11, %30 : vector<16x128xf32>
    %32 = math.tanh %31 : vector<16x128xf32>
    %33 = arith.mulf %20, %8 : vector<16x128xf32>
    %cst_23 = arith.constant 1.000000e+00 : f32
    %34 = vector.broadcast %cst_23 : f32 to vector<16x128xf32>
    %35 = arith.subf %34, %20 : vector<16x128xf32>
    %36 = arith.mulf %35, %32 : vector<16x128xf32>
    %37 = arith.addf %33, %36 : vector<16x128xf32>
    %cst_24 = arith.constant 0.000000e+00 : f32
    %38 = vector.broadcast %cst_24 : f32 to vector<16x128xf32>
    %39 = arith.maximumf %37, %38 : vector<16x128xf32>
    %c0_25 = arith.constant 0 : index
    %c0_26 = arith.constant 0 : index
    %40 = vector.load %arg6[%c0_25, %c0_26] : memref<1x128xf32, #tpu.memory_space<vmem>>, vector<1x128xf32>
    %41 = vector.broadcast %40 : vector<1x128xf32> to vector<16x128xf32>
    %42 = arith.mulf %39, %41 : vector<16x128xf32>
    %cst_27 = arith.constant dense<0.000000e+00> : vector<16xf32>
    %43 = vector.multi_reduction <add>, %42, %cst_27 [1] : vector<16x128xf32> to vector<16xf32>
    %44 = vector.shape_cast %43 : vector<16xf32> to vector<16x1xf32>
    %45 = vector.broadcast %7 : f32 to vector<16x1xf32>
    %46 = arith.addf %44, %45 : vector<16x1xf32>
    %c0_28 = arith.constant 0 : index
    %c0_29 = arith.constant 0 : index
    %47 = vector.load %arg8[%c0_28, %c0_29] : memref<16x1xf32, #tpu.memory_space<vmem>>, vector<16x1xf32>
    tpu.vector_store %arg8[%c0_28, %c0_29], %46 {strides = array<i32>} : memref<16x1xf32, #tpu.memory_space<vmem>>, vector<16x1xf32>,
    %c0_30 = arith.constant 0 : index
    %c0_31 = arith.constant 0 : index
    %48 = vector.load %arg9[%c0_30, %c0_31] : memref<16x128xf32, #tpu.memory_space<vmem>>, vector<16x128xf32>
    tpu.vector_store %arg9[%c0_30, %c0_31], %37 {strides = array<i32>} : memref<16x128xf32, #tpu.memory_space<vmem>>, vector<16x128xf32>,
    return
  }
}

</mosaic_0001>

<bundles_post_ra>
// kernel: my_tgcn_forward.1
= control target key start
LH: loop header
LB: loop body
LE: loop exit
PB: predicated region body
PF: predicated region fallthrough
CT: control target
= control target key end

     0   :  { %16 = vsyncpa [#allocation5], 0  ;;  %s1048_s0 = inlined_call_operand.hbm [shape: f32[16,16], index: 0, kind: input, shape index: {}]   ;;  %s1049_s1 = inlined_call_operand.vmem [shape: f32[16,384], index: 1, kind: input, shape index: {}]   ;;  %s1050_s2 = inlined_call_operand.vmem [shape: f32[1,384], index: 2, kind: input, shape index: {}]   ;;  %s1051_s3 = inlined_call_operand.vmem [shape: f32[16,128], index: 3, kind: input, shape index: {}]   ;;  %s1052_s4 = inlined_call_operand.vmem [shape: f32[128,256], index: 4, kind: input, shape index: {}]   ;;  %s1053_s5 = inlined_call_operand.vmem [shape: f32[128,128], index: 5, kind: input, shape index: {}]   ;;  %s1054_s6 = inlined_call_operand.vmem [shape: f32[1,128], index: 6, kind: input, shape index: {}]   ;;  %s1055_s7 = inlined_call_operand.<no memory space> [shape: f32[1,1], index: 7, kind: input, shape index: {}]   ;;  %s1056_s8 = inlined_call_operand.vmem [shape: f32[16,1], index: 8, kind: output, shape index: {0}]   ;;  %s1057_s9 = inlined_call_operand.hbm [shape: f32[16,128], index: 9, kind: output, shape index: {1}]  }
   0x1   :  { %17 = vsyncpa [#allocation6], 0  ;;  %s762_s30 = smov [#allocation4]   ;;  %s714_s13 = scalar_lea.hbm %s1048_s0, 256 }
   0x2   :  { %s23_s10 = sshll.u32 %s762_s30, 4  ;;  %p715_p0 = scmp.ne.s32.totalorder %s1048_s0, %s714_s13  ;;  %s24_s10 = int_to_ptr.vmem [resolvable:$true] %s23_s10 }
   0x3   :  { %p718_p1 = scmp.lt.u32.totalorder %s714_s13, %s1048_s0 }
   0x5   :  { %p720_p2 = pnand %p718_p1, %p715_p0 }
   0x7   :  { %723 = shalt.err (!%p720_p2)
}
   0x8   :  { %s724_s18 = scalar_lea.vmem %s24_s10, 256  ;;  %p729_p4 = scmp.lt.s32.totalorder %s24_s10, %s24_s10 }
   0x9   :  { %p725_p3 = scmp.ne.s32.totalorder %s24_s10, %s724_s18  ;;  %p730_p5 = scmp.lt.s32.totalorder %s724_s18, %s724_s18 }
   0xb   :  { %p731_p6 = por %p730_p5, %p729_p4 }
   0xd   :  { %p732_p7 = pnand %p731_p6, %p725_p3 }
   0xf   :  { %735 = shalt.err (!%p732_p7)
}
  0x10   :  { %s763_s19 = smov 128   ;;  %s764_s20 = smov 8  }
  0x11   :  { %29 = dma.hbm_to_vmem [thread:$0]  %s1048_s0, 256, %s24_s10, [#allocation5], %s763_s19, %s763_s19, %s764_s20  }
  0x12   :  { %758 = dma.done.wait [#allocation5], 256  }
  0x13   :  { %759 = vsyncadd [#allocation5], 4294967040  ;;  %v765_v0 = vmov 0.0   ;;  %v50_v1 = vld [vmem:[%s1049_s1 + $0x8] sm:$0xff]  ;;  %v53_v2 = vld [vmem:[%s1049_s1 + $0x20] sm:$0xff]  ;;  %vm72_vm0 = vcmask 130048  }
  0x14   :  { %143 = vmatprep.mubr.f32.mxu0 %v765_v0  ;;  %v49_v3 = vld [vmem:[%s1049_s1] sm:$0xff]  ;;  %v605_v4 = vpack.c.bf16 %v53_v2, %v50_v1  ;;  %v52_v5 = vld [vmem:[%s1049_s1 + $0x18] sm:$0xff]  ;;  %v247_v6 = vld [vmem:[%s1052_s4 + $0x8] sm:$0xff]  ;;  %s766_s0 = smov [#allocation7]  }
  0x15   :  { %v249_v7 = vld [vmem:[%s1052_s4 + $0x18] sm:$0xff]  ;;  %v607_v8 = vpack.c.bf16 %v52_v5, %v49_v3  ;;  %v47_v10 = vld [vmem:[#allocation4] sm:$0xff]  ;;  %v246_v11 = vld [vmem:[%s1052_s4] sm:$0xff]  ;;  %s518_s30 = sshll.u32 %s766_s0, 4  ;;  %s519_s30 = int_to_ptr.vmem [resolvable:$true] %s518_s30 }
  0x16   :  { %v613_v9 = vpack.c.bf16 %v249_v7, %v247_v6  ;;  %v248_v12 = vld [vmem:[%s1052_s4 + $0x10] sm:$0xff]  ;;  %606 = vmatprep.subr.bf16.mxu0 %v605_v4  ;;  %v251_v13 = vld [vmem:[%s1052_s4 + $0x28] sm:$0xff]  ;;  %v253_v14 = vld [vmem:[%s1052_s4 + $0x38] sm:$0xff]  ;;  %567 = vmatprep.mubr.msk.f32.mxu1 %vm72_vm0, %v47_v10  ;;  %s736_s10 = scalar_lea.vmem %s519_s30, 256  ;;  %p741_p9 = scmp.lt.s32.totalorder %s519_s30, %s519_s30 }
  0x17   :  { %608 = vmatpush1.bf16.msra.mxu0 %v607_v8  ;;  %v615_v15 = vpack.c.bf16 %v248_v12, %v246_v11  ;;  %v617_v16 = vpack.c.bf16 %v253_v14, %v251_v13  ;;  %v250_v17 = vld [vmem:[%s1052_s4 + $0x20] sm:$0xff]  ;;  %v252_v18 = vld [vmem:[%s1052_s4 + $0x30] sm:$0xff]  ;;  %v255_v19 = vld [vmem:[%s1052_s4 + $0x48] sm:$0xff]  ;;  %p737_p8 = scmp.ne.s32.totalorder %s519_s30, %s736_s10  ;;  %p742_p10 = scmp.lt.s32.totalorder %s736_s10, %s736_s10 }
  0x18   :  { %614 = vmatprep.subr.bf16.mxu0 %v613_v9  ;;  %v257_v20 = vld [vmem:[%s1052_s4 + $0x58] sm:$0xff]  ;;  %v619_v21 = vpack.c.bf16 %v252_v18, %v250_v17  ;;  %v254_v23 = vld [vmem:[%s1052_s4 + $0x40] sm:$0xff]  ;;  %v256_v24 = vld [vmem:[%s1052_s4 + $0x50] sm:$0xff] }
  0x19   :  { %v621_v22 = vpack.c.bf16 %v257_v20, %v255_v19  ;;  %v259_v25 = vld [vmem:[%s1052_s4 + $0x68] sm:$0xff]  ;;  %v261_v26 = vld [vmem:[%s1052_s4 + $0x78] sm:$0xff]  ;;  %v623_v28 = vpack.c.bf16 %v256_v24, %v254_v23  ;;  %v258_v29 = vld [vmem:[%s1052_s4 + $0x60] sm:$0xff]  ;;  %p743_p11 = por %p742_p10, %p741_p9 }
  0x1a   :  { %532 = vmatmul.mubr.msk.f32.vlgmr.msra.gmra.mrb[0].mxu0 %vm72_vm0, %v47_v10  ;;  %v48_v27 = vld [vmem:[#allocation4 + $0x8] sm:$0xff]  ;;  %v625_v30 = vpack.c.bf16 %v261_v26, %v259_v25  ;;  %v260_v31 = vld [vmem:[%s1052_s4 + $0x70] sm:$0xff]  ;;  %v54_v33 = vld [vmem:[%s1049_s1 + $0x28] sm:$0xff] }
  0x1b   :  { %616 = vmatpush1.bf16.msra.mxu0 %v615_v15  ;;  %149 = vmatprep.mubr.f32.mxu0 %v765_v0  ;;  %v51_v32 = vld [vmem:[%s1049_s1 + $0x10] sm:$0xff]  ;;  %v263_v34 = vld [vmem:[%s1052_s4 + $0x88] sm:$0xff]  ;;  %v265_v35 = vld [vmem:[%s1052_s4 + $0x98] sm:$0xff]  ;;  %v627_v37 = vpack.c.bf16 %v260_v31, %v258_v29  ;;  %p744_p12 = pnand %p743_p11, %p737_p8 }
  0x1c   :  { %618 = vmatprep.subr.bf16.mxu0 %v617_v16  ;;  %v609_v36 = vpack.c.bf16 %v54_v33, %v51_v32  ;;  %v629_v38 = vpack.c.bf16 %v265_v35, %v263_v34  ;;  %v262_v39 = vld [vmem:[%s1052_s4 + $0x80] sm:$0xff]  ;;  %v264_v40 = vld [vmem:[%s1052_s4 + $0x90] sm:$0xff]  ;;  %v267_v41 = vld [vmem:[%s1052_s4 + $0xa8] sm:$0xff] }
  0x1d   :  { %v269_v42 = vld [vmem:[%s1052_s4 + $0xb8] sm:$0xff]  ;;  %v631_v43 = vpack.c.bf16 %v264_v40, %v262_v39  ;;  %v266_v45 = vld [vmem:[%s1052_s4 + $0xa0] sm:$0xff]  ;;  %v268_v46 = vld [vmem:[%s1052_s4 + $0xb0] sm:$0xff] }
  0x1e   :  { %533 = vmatmul.mubr.msk.f32.gmra.mrb[2].mxu0 %vm72_vm0, %v48_v27  ;;  %610 = vmatprep.subr.bf16.mxu1 %v609_v36  ;;  %v633_v44 = vpack.c.bf16 %v269_v42, %v267_v41  ;;  %v271_v47 = vld [vmem:[%s1052_s4 + $0xc8] sm:$0xff]  ;;  %v273_v48 = vld [vmem:[%s1052_s4 + $0xd8] sm:$0xff]  ;;  %v635_v49 = vpack.c.bf16 %v268_v46, %v266_v45  ;;  %v270_v51 = vld [vmem:[%s1052_s4 + $0xc0] sm:$0xff] }
  0x1f   :  { %620 = vmatpush1.bf16.msra.mxu0 %v619_v21  ;;  %342 = vmatprep.mubr.f32.mxu0 %v765_v0  ;;  %v637_v50 = vpack.c.bf16 %v273_v48, %v271_v47  ;;  %v272_v52 = vld [vmem:[%s1052_s4 + $0xd0] sm:$0xff]  ;;  %v275_v53 = vld [vmem:[%s1052_s4 + $0xe8] sm:$0xff]  ;;  %v277_v54 = vld [vmem:[%s1052_s4 + $0xf8] sm:$0xff] }
  0x20   :  { %622 = vmatprep.subr.bf16.mxu0 %v621_v22  ;;  %612 = vmatpush3.bf16.msra.mxu1 %v609_v36  ;;  %v639_v55 = vpack.c.bf16 %v272_v52, %v270_v51  ;;  %v641_v56 = vpack.c.bf16 %v277_v54, %v275_v53  ;;  %v274_v57 = vld [vmem:[%s1052_s4 + $0xe0] sm:$0xff]  ;;  %v276_v58 = vld [vmem:[%s1052_s4 + $0xf0] sm:$0xff]  ;;  %v963_v61 = vld [vmem:[%s1051_s3 + $0x8] sm:$0xff]  ;;  %v57_v22 = vlaneseq }
  0x21   :  { %v643_v59 = vpack.c.bf16 %v276_v58, %v274_v57  ;;  %v956_v60 = vld [vmem:[%s1051_s3] sm:$0xff]  ;;  %v386_v63 = vld [vmem:[%s1053_s5 + $0x8] sm:$0xff]  ;;  %v388_v2 = vld [vmem:[%s1053_s5 + $0x18] sm:$0xff] }
  0x22   :  { %v385_v62 = vld [vmem:[%s1053_s5] sm:$0xff]  ;;  %v390_v5 = vld [vmem:[%s1053_s5 + $0x28] sm:$0xff]  ;;  %v391_v7 = vld [vmem:[%s1053_s5 + $0x30] sm:$0xff]  ;;  %v58_v23 = vshrl.u32 %v57_v22, 7 }
  0x23   :  { %624 = vmatpush1.bf16.msra.mxu0 %v623_v28  ;;  %568 = vmatmul.mubr.msk.f32.vlgmr.msra.gmra.mrb[0].mxu1 %vm72_vm0, %v48_v27  ;;  %v645_v1 = vpack.c.bf16 %v386_v63, %v385_v62  ;;  %v389_v4 = vld [vmem:[%s1053_s5 + $0x20] sm:$0xff]  ;;  %v392_v8 = vld [vmem:[%s1053_s5 + $0x38] sm:$0xff]  ;;  %v394_v11 = vld [vmem:[%s1053_s5 + $0x48] sm:$0xff] }
  0x24   :  { %626 = vmatprep.subr.bf16.mxu0 %v625_v30  ;;  %v653_v6 = vpack.c.bf16 %v390_v5, %v389_v4  ;;  %v657_v9 = vpack.c.bf16 %v392_v8, %v391_v7  ;;  %v393_v10 = vld [vmem:[%s1053_s5 + $0x40] sm:$0xff]  ;;  %v395_v13 = vld [vmem:[%s1053_s5 + $0x50] sm:$0xff]  ;;  %v396_v14 = vld [vmem:[%s1053_s5 + $0x58] sm:$0xff]  ;;  %v63_v24 = vsub.s32 1, %v58_v23  ;;  %v67_v51 = vsub.s32 2, %v58_v23 }
  0x25   :  { %646 = vmatprep.subr.bf16.mxu1 %v645_v1  ;;  %v661_v12 = vpack.c.bf16 %v394_v11, %v393_v10  ;;  %v665_v15 = vpack.c.bf16 %v396_v14, %v395_v13  ;;  %v397_v16 = vld [vmem:[%s1053_s5 + $0x60] sm:$0xff]  ;;  %v398_v17 = vld [vmem:[%s1053_s5 + $0x68] sm:$0xff]  ;;  %v399_v18 = vld [vmem:[%s1053_s5 + $0x70] sm:$0xff] }
  0x26   :  { %648 = vmatpush3.bf16.msra.mxu1 %v645_v1  ;;  %v669_v19 = vpack.c.bf16 %v398_v17, %v397_v16  ;;  %v400_v20 = vld [vmem:[%s1053_s5 + $0x78] sm:$0xff]  ;;  %v55_v25 = vld [vmem:[%s1050_s2] sm:$0x7] }
  0x27   :  { %628 = vmatpush1.bf16.msra.mxu0 %v627_v37  ;;  %v673_v21 = vpack.c.bf16 %v400_v20, %v399_v18  ;;  %v64_v26 = vrot.slane %v55_v25, %v63_v24  ;;  %v68_v54 = vrot.slane %v55_v25, %v67_v51 }
  0x28   :  { %630 = vmatprep.subr.bf16.mxu0 %v629_v38 }
  0x2b   :  { %632 = vmatpush1.bf16.msra.mxu0 %v631_v43  ;;  %v59_v43 = vsub.s32 0, %v58_v23 }
  0x2c   :  { %634 = vmatprep.subr.bf16.mxu0 %v633_v44 }
  0x2d   :  { %v60_v44 = vrot.slane %v55_v25, %v59_v43 }
  0x2f   :  { %636 = vmatpush1.bf16.msra.mxu0 %v635_v49 }
  0x30   :  { %638 = vmatprep.subr.bf16.mxu0 %v637_v50 }
  0x33   :  { %640 = vmatpush1.bf16.msra.mxu0 %v639_v55 }
  0x34   :  { %642 = vmatprep.subr.bf16.mxu0 %v641_v56 }
  0x37   :  { %644 = vmatpush1.bf16.msra.mxu0 %v643_v59 }
  0x3a   :  { %343 = vmatmul.mubr.f32.vlgmr.msra.gmra.mrb[0].mxu0 %v956_v60 }
  0x3b   :  { %348 = vmatprep.mubr.f32.mxu0 %v765_v0  ;;  %v387_v0 = vld [vmem:[%s1053_s5 + $0x10] sm:$0xff] }
  0x3c   :  { %v649_v3 = vpack.c.bf16 %v388_v2, %v387_v0 }
  0x3e   :  { %349 = vmatmul.mubr.f32.gmra.mrb[2].mxu0 %v963_v61  ;;  %650 = vmatprep.subr.bf16.mxu1 %v649_v3 }
  0x3f   :  { %652 = vmatpush3.bf16.msra.mxu1 %v649_v3 }
  0x40   :  { %654 = vmatprep.subr.bf16.mxu1 %v653_v6 }
  0x43   :  { %656 = vmatpush3.bf16.msra.mxu1 %v653_v6 }
  0x44   :  { %658 = vmatprep.subr.bf16.mxu1 %v657_v9 }
  0x47   :  { %660 = vmatpush3.bf16.msra.mxu1 %v657_v9  ;;  %v540_v9 = vld [vmem:[%s1054_s6] ss:$0 sm:$0xff] }
  0x48   :  { %662 = vmatprep.subr.bf16.mxu1 %v661_v12 }
  0x4b   :  { %664 = vmatpush3.bf16.msra.mxu1 %v661_v12 }
  0x4c   :  { %666 = vmatprep.subr.bf16.mxu1 %v665_v15 }
  0x4f   :  { %668 = vmatpush3.bf16.msra.mxu1 %v665_v15 }
  0x50   :  { %670 = vmatprep.subr.bf16.mxu1 %v669_v19 }
  0x53   :  { %672 = vmatpush3.bf16.msra.mxu1 %v669_v19 }
  0x54   :  { %674 = vmatprep.subr.bf16.mxu1 %v673_v21 }
  0x57   :  { %676 = vmatpush3.bf16.msra.mxu1 %v673_v21 }
 0x10d   :  { %v344_v27 = vpop.f32.mrb[0].mxu0 }
 0x10e   :  { %v346_v28 = vpop.f32.mrb[1].mxu0  ;;  %v677_v46 = vadd.f32 %v344_v27, %v60_v44 }
 0x10f   :  { %v678_v29 = vadd.f32 %v346_v28, %v64_v26 }
 0x110   :  { %v536_v48 = vmul.f32 -1.442695, %v677_v46 }
 0x111   :  { %v538_v30 = vmul.f32 -1.442695, %v678_v29  ;;  %v350_v31 = vpop.f32.mrb[2].mxu0 }
 0x112   :  { %v352_v32 = vpop.f32.mrb[3].mxu0  ;;  %v679_v45 = vadd.f32 %v350_v31, %v60_v44 }
 0x113   :  { %694 = vpow2.f32 %v538_v30  ;;  %v680_v33 = vadd.f32 %v352_v32, %v64_v26 }
 0x114   :  { %v537_v47 = vmul.f32 -1.442695, %v679_v45 }
 0x115   :  { %v539_v34 = vmul.f32 -1.442695, %v680_v33 }
 0x117   :  { %696 = vpow2.f32 %v539_v34 }
 0x11d   :  { %v695_v35 = vpop.eup %694 }
 0x11e   :  { %v377_v36 = vadd.f32 1.0, %v695_v35 }
 0x120   :  { %698 = vrcp.f32 %v377_v36 }
 0x121   :  { %v697_v37 = vpop.eup %696 }
 0x122   :  { %v378_v38 = vadd.f32 1.0, %v697_v37 }
 0x124   :  { %700 = vrcp.f32 %v378_v38 }
 0x125   :  { %702 = vpow2.f32 %v537_v47 }
 0x126   :  { %704 = vpow2.f32 %v536_v48 }
 0x12a   :  { %v699_v39 = vpop.eup %698 }
 0x12b   :  { %v383_v40 = vmul.f32 %v699_v39, %v956_v60 }
 0x12d   :  { %602 = vmatprep.mubr.f32.mxu1 %v383_v40 }
 0x12e   :  { %v701_v41 = vpop.eup %700 }
 0x12f   :  { %v384_v42 = vmul.f32 %v701_v41, %v963_v61  ;;  %v703_v49 = vpop.eup %702 }
 0x130   :  { %v705_v50 = vpop.eup %704  ;;  %v364_v52 = vadd.f32 1.0, %v703_v49 }
 0x131   :  { %603 = vmatmul.mubr.f32.vlgmr.msra.gmra.mrb[0].mxu1 %v384_v42  ;;  %v363_v53 = vadd.f32 1.0, %v705_v50 }
 0x132   :  { %706 = vrcp.f32 %v364_v52 }
 0x133   :  { %708 = vrcp.f32 %v363_v53 }
 0x13c   :  { %v707_v59 = vpop.eup %706 }
 0x13d   :  { %v709_v62 = vpop.eup %708  ;;  %v483_v63 = vsub.f32 1.0, %v707_v59  ;;  %v481_v3 = vmul.f32 %v707_v59, %v963_v61 }
 0x13e   :  { %v482_v0 = vsub.f32 1.0, %v709_v62  ;;  %v480_v5 = vmul.f32 %v709_v62, %v956_v60 }
 0x204   :  { %v604_v55 = vpop.f32.mrb[0].mxu1 }
 0x205   :  { %v681_v56 = vadd.f32 %v604_v55, %v68_v54  ;;  %v467_v57 = vpop.f32.mrb[1].mxu1 }
 0x206   :  { %v682_v58 = vadd.f32 %v467_v57, %v68_v54 }
 0x207   :  { %710 = vtanh.f32 %v681_v56 }
 0x208   :  { %712 = vtanh.f32 %v682_v58 }
 0x211   :  { %v711_v1 = vpop.eup %710 }
 0x212   :  { %v713_v2 = vpop.eup %712  ;;  %v485_v4 = vmul.f32 %v711_v1, %v483_v63 }
 0x213   :  { %v484_v6 = vmul.f32 %v713_v2, %v482_v0 }
 0x214   :  { %v487_v7 = vadd.f32 %v485_v4, %v481_v3 }
 0x215   :  { %v486_v8 = vadd.f32 %v484_v6, %v480_v5 }
 0x216   :  { %510 = vst [vmem:[#allocation7 + $0x8] sm:$0xff] %v487_v7  ;;  %v489_v12 = vmax.f32 %v487_v7, 0.0 }
 0x217   :  { %v488_v10 = vmax.f32 %v486_v8, 0.0  ;;  %509 = vst [vmem:[#allocation7] sm:$0xff] %v486_v8 }
 0x218   :  { %v498_v13 = vmul.f32 %v540_v9, %v489_v12 }
 0x219   :  { %v497_v11 = vmul.f32 %v540_v9, %v488_v10 }
 0x21b   :  { %499 = vadd.xlane.f32.xlu0 %v497_v11 }
 0x21f   :  { %501 = vadd.xlane.f32.xlu0 %v498_v13 }
 0x220   :  { %747 = shalt.err (!%p744_p12)
}
 0x221   :  { %s748_s11 = scalar_lea.hbm %s1057_s9, 256 }
 0x222   :  { %p749_p13 = scmp.ne.s32.totalorder %s1057_s9, %s748_s11  ;;  %p752_p0 = scmp.lt.u32.totalorder %s748_s11, %s1057_s9 }
 0x224   :  { %p754_p1 = pnand %p752_p0, %p749_p13 }
 0x226   :  { %757 = shalt.err (!%p754_p1)
}
 0x227   :  { %524 = dma.vmem_to_hbm [thread:$0]  %s519_s30, 256, %s1057_s9, [#allocation6], %s763_s19, %s763_s19, %s764_s20   ;;  %vm506_vm1 = vcmask 7168  }
 0x228   :  { %v503_v60 = vstv %s1055_s7 }
 0x2a8   :  { %v500_v61 = vpop.xlane.xlu0 %499 }
 0x2a9   :  { %v504_v14 = vadd.f32 %v503_v60, %v500_v61 }
 0x2ab   :  { %507 = vst.msk [vmem:[%s1056_s8] sm:$0xff] %vm506_vm1, %v504_v14 }
 0x2ac   :  { %v502_v15 = vpop.xlane.xlu0 %501 }
 0x2ad   :  { %v505_v16 = vadd.f32 %v503_v60, %v502_v15 }
 0x2af   :  { %508 = vst.msk [vmem:[%s1056_s8 + $0x8] sm:$0xff] %vm506_vm1, %v505_v16 }
 0x2b0   :  { %760 = dma.done.wait [#allocation6], 256  }
 0x2b1   :  { %761 = vsyncadd [#allocation6], 4294967040 }
 0x2b2   :  { %530 = vsyncpa [#allocation5], 1 }
 0x2b3   :  { %531 = vsyncpa [#allocation6], 1 }

</bundles_post_ra>
